<compile_context>
chip_gen: v7x
topology: tpu7x:2x2x1
jax: 0.10.0
libtpu: 0.0.40
codegen_flags: <defaults>
</compile_context>

<pallas_src>
import math
import jax
import jax.numpy as jnp
from jax.experimental import pallas as pl
from jax.experimental.pallas import tpu as pltpu


def _round_up(x, m):
    return ((x + m - 1) // m) * m


# ----------------------------- Pallas kernel ---------------------------------

def _bn_relu_conv1x1_kernel(x_ref, scale_ref, shift_ref, w_ref, b_ref, o_ref):
    # x_ref:     (Cin, TM)   f32   spatial tile, lanes = spatial pixels
    # scale_ref: (Cin, 1)    f32   folded BN scale
    # shift_ref: (Cin, 1)    f32   folded BN shift
    # w_ref:     (Cout, Cin) f32   1x1 conv weight
    # b_ref:     (Cout, 1)   f32
    # o_ref:     (Cout, TM)  f32
    y = jnp.maximum(x_ref[...] * scale_ref[...] + shift_ref[...], 0.0)     # BN + ReLU (VPU)
    o_ref[...] = (
        jnp.dot(w_ref[...], y, preferred_element_type=jnp.float32)          # MXU
        + b_ref[...]
    )


def _choose_tm(m, cin, cout, n):
    """Balanced spatial tile size: a multiple of 128, or the full extent M."""
    # Bytes per spatial lane: double-buffered x + out blocks plus one temp each.
    per_lane = 4 * 3 * (cin + cout)
    # Constant operands (w, scale, shift, b), assumed double-buffered.
    const_bytes = 2 * 4 * (cin * cout + 2 * cin + cout)
    budget = 20 * 1024 * 1024                       # well under the 48 MiB we request
    avail = max(budget - const_bytes, 2 * 1024 * 1024)
    tm_cap = max(128, min((avail // per_lane) // 128 * 128, 32768))

    m128 = _round_up(m, 128)
    n_tiles = pl.cdiv(m128, tm_cap)                 # capacity-driven tile count
    # v7x has 2 TensorCores: keep >= 2 "parallel" grid steps when possible.
    if n * n_tiles < 2 and m >= 256:
        n_tiles = 2
    if n_tiles == 1:
        return m                                    # single full-extent tile
    # Balanced tiles, <= 127 wasted lanes per tile (handled by Pallas masking).
    return _round_up(pl.cdiv(m128, n_tiles), 128)


def _bn_relu_conv1x1(x3d, scale, shift, w, b):
    # x3d: (N, Cin, M) ; scale/shift: (Cin, 1) ; w: (Cout, Cin) ; b: (Cout, 1)
    n, cin, m = x3d.shape
    cout = w.shape[0]
    tm = _choose_tm(m, cin, cout, n)
    grid = (n, pl.cdiv(m, tm))                       # ragged last tile is masked

    cost = pl.CostEstimate(
        flops=2 * n * m * cin * cout,
        transcendentals=0,
        bytes_accessed=4 * (n * m * (cin + cout) + cin * cout + 2 * cin + cout),
    )

    return pl.pallas_call(
        _bn_relu_conv1x1_kernel,
        out_shape=jax.ShapeDtypeStruct((n, cout, m), jnp.float32),
        grid_spec=pltpu.PrefetchScalarGridSpec(
            num_scalar_prefetch=0,
            grid=grid,
            in_specs=[
                # x tile: squeeze batch dim, channels on sublanes, spatial on lanes
                pl.BlockSpec((None, cin, tm), lambda nb, mi: (nb, 0, mi)),
                # constant blocks (index never changes -> fetched once, kept resident)
                pl.BlockSpec((cin, 1), lambda nb, mi: (0, 0)),
                pl.BlockSpec((cin, 1), lambda nb, mi: (0, 0)),
                pl.BlockSpec((cout, cin), lambda nb, mi: (0, 0)),
                pl.BlockSpec((cout, 1), lambda nb, mi: (0, 0)),
            ],
            out_specs=pl.BlockSpec((None, cout, tm), lambda nb, mi: (nb, 0, mi)),
        ),
        compiler_params=pltpu.CompilerParams(
            dimension_semantics=("parallel", "parallel"),
            vmem_limit_bytes=48 * 1024 * 1024,
        ),
        cost_estimate=cost,
    )(x3d, scale, shift, w, b)


# ----------------------------- Module wrapper --------------------------------

class SkipLayer:
    """JAX/Pallas port of skipLayer (inference-mode BatchNorm)."""

    def __init__(self, num_in, num_out, stride, use_conv, key):
        self.num_in = num_in
        self.num_out = num_out
        self.stride = stride
        self.identity = (num_in == num_out) and (stride == 1) and (not use_conv)
        if self.identity:
            return

        k_w, k_b, k_g, k_bt, k_m, k_v = jax.random.split(key, 6)

        # Conv2d(num_in, num_out, kernel_size=1, stride) weight: (Cout, Cin)
        # xavier_normal with gain=sqrt(1/2)
        gain = math.sqrt(1.0 / 2.0)
        std = gain * math.sqrt(2.0 / (num_in + num_out))
        conv_w = std * jax.random.normal(k_w, (num_out, num_in), dtype=jnp.float32)
        bound = 1.0 / math.sqrt(num_in)
        conv_b = jax.random.uniform(
            k_b, (num_out,), minval=-bound, maxval=bound, dtype=jnp.float32
        )

        # BatchNorm2d(num_in) params (synthetic, inference-mode running stats)
        gamma = 1.0 + 0.1 * jax.random.normal(k_g, (num_in,), dtype=jnp.float32)
        beta = 0.1 * jax.random.normal(k_bt, (num_in,), dtype=jnp.float32)
        running_mean = 0.1 * jax.random.normal(k_m, (num_in,), dtype=jnp.float32)
        running_var = 1.0 + 0.1 * jax.random.uniform(k_v, (num_in,), dtype=jnp.float32)
        eps = 1e-5

        inv_std = 1.0 / jnp.sqrt(running_var + eps)
        self.scale = (gamma * inv_std).reshape(num_in, 1)                         # (Cin,1)
        self.shift = (beta - gamma * running_mean * inv_std).reshape(num_in, 1)   # (Cin,1)
        self.w = conv_w                                                           # (Cout,Cin)
        self.b = conv_b.reshape(num_out, 1)                                       # (Cout,1)

    def __call__(self, x):
        # x: NCHW float32
        if self.identity:
            return x
        n, c, h, w = x.shape
        s = self.stride
        if s != 1:
            # 1x1 conv with stride == spatial subsample (commutes with pointwise BN/ReLU)
            x = x[:, :, ::s, ::s]
        ho, wo = x.shape[2], x.shape[3]
        # NCHW -> (N, Cin, Ho*Wo): pure reshape, no transpose / extra HBM pass.
        x3d = x.reshape(n, c, ho * wo)
        out3d = _bn_relu_conv1x1(x3d, self.scale, self.shift, self.w, self.b)
        return out3d.reshape(n, self.num_out, ho, wo)


# ----------------------------- Reference (pure JAX) --------------------------

def _reference(layer: SkipLayer, x):
    if layer.identity:
        return x
    scale = layer.scale.reshape(1, -1, 1, 1)
    shift = layer.shift.reshape(1, -1, 1, 1)
    y = jnp.maximum(x * scale + shift, 0.0)
    y = y[:, :, ::layer.stride, ::layer.stride]
    out = jnp.einsum("nchw,dc->ndhw", y, layer.w) + layer.b.reshape(1, -1, 1, 1)
    return out


if __name__ == "__main__":
    key = jax.random.PRNGKey(0)
    k_x, k_p, k_x2, k_p2 = jax.random.split(key, 4)

    # --- Main case: numIn=4 -> numOut=8, stride=2 (non-identity branch) -------
    N, C_IN, C_OUT, H, W, STRIDE = 2, 4, 8, 16, 16, 2
    x = jax.random.normal(k_x, (N, C_IN, H, W), dtype=jnp.float32)

    layer = SkipLayer(C_IN, C_OUT, STRIDE, use_conv=True, key=k_p)
    out = jax.block_until_ready(layer(x))
    ref = jax.block_until_ready(_reference(layer, x))
    assert out.shape == (N, C_OUT, H // STRIDE, W // STRIDE), out.shape
    assert jnp.allclose(out, ref, atol=1e-4, rtol=1e-4)

    # --- Stride-1 non-identity (useConv) path: single full-extent tile --------
    layer_s1 = SkipLayer(C_IN, C_IN, 1, use_conv=True, key=k_p)
    out_s1 = jax.block_until_ready(layer_s1(x))
    ref_s1 = jax.block_until_ready(_reference(layer_s1, x))
    assert jnp.allclose(out_s1, ref_s1, atol=1e-4, rtol=1e-4)

    # --- Multi-tile ragged path (M=5184 not a tile multiple, masked last tile) -
    x2 = jax.random.normal(k_x2, (1, 8, 72, 72), dtype=jnp.float32)
    layer_big = SkipLayer(8, 16, 1, use_conv=True, key=k_p2)
    out_big = jax.block_until_ready(layer_big(x2))
    ref_big = jax.block_until_ready(_reference(layer_big, x2))
    assert out_big.shape == (1, 16, 72, 72), out_big.shape
    assert jnp.allclose(out_big, ref_big, atol=1e-4, rtol=1e-4)

    # --- Identity branch sanity check -----------------------------------------
    layer_id = SkipLayer(C_IN, C_IN, 1, use_conv=False, key=k_p)
    out_id = jax.block_until_ready(layer_id(x))
    assert jnp.array_equal(out_id, x)

    print("KERNEL_OK")
</pallas_src>

<mosaic_0001>
module attributes {stable_mosaic.version = 11 : i64} {
  func.func @_bn_relu_conv1x1_kernel(%arg0: i32, %arg1: i32, %arg2: memref<1x4x64xf32, #tpu.memory_space<vmem>>, %arg3: memref<4x1xf32, #tpu.memory_space<vmem>>, %arg4: memref<4x1xf32, #tpu.memory_space<vmem>>, %arg5: memref<8x4xf32, #tpu.memory_space<vmem>>, %arg6: memref<8x1xf32, #tpu.memory_space<vmem>>, %arg7: memref<1x8x64xf32, #tpu.memory_space<vmem>>) attributes {dimension_semantics = [#tpu.dimension_semantics<parallel>, #tpu.dimension_semantics<parallel>], iteration_bounds = array<i64: 2, 1>, scalar_prefetch = 0 : i64, scratch_operands = 0 : i64, tpu.core_type = #tpu.core_type<tc>, window_params = [{transform_indices = @transform_0, window_bounds = array<i64: 1, 4, 64>}, {pipeline_mode = #tpu.pipeline_mode<synchronous>, transform_indices = @transform_1, window_bounds = array<i64: 4, 1>}, {pipeline_mode = #tpu.pipeline_mode<synchronous>, transform_indices = @transform_2, window_bounds = array<i64: 4, 1>}, {pipeline_mode = #tpu.pipeline_mode<synchronous>, transform_indices = @transform_3, window_bounds = array<i64: 8, 4>}, {pipeline_mode = #tpu.pipeline_mode<synchronous>, transform_indices = @transform_4, window_bounds = array<i64: 8, 1>}, {transform_indices = @transform_5, window_bounds = array<i64: 1, 8, 64>}]} {
    %c0 = arith.constant 0 : index
    %c0_0 = arith.constant 0 : index
    %c0_1 = arith.constant 0 : index
    %0 = vector.load %arg2[%c0, %c0_0, %c0_1] : memref<1x4x64xf32, #tpu.memory_space<vmem>>, vector<1x4x64xf32>
    %1 = vector.shape_cast %0 : vector<1x4x64xf32> to vector<4x64xf32>
    %c0_2 = arith.constant 0 : index
    %c0_3 = arith.constant 0 : index
    %2 = vector.load %arg3[%c0_2, %c0_3] : memref<4x1xf32, #tpu.memory_space<vmem>>, vector<4x1xf32>
    %3 = vector.broadcast %2 : vector<4x1xf32> to vector<4x64xf32>
    %4 = arith.mulf %1, %3 : vector<4x64xf32>
    %c0_4 = arith.constant 0 : index
    %c0_5 = arith.constant 0 : index
    %5 = vector.load %arg4[%c0_4, %c0_5] : memref<4x1xf32, #tpu.memory_space<vmem>>, vector<4x1xf32>
    %6 = vector.broadcast %5 : vector<4x1xf32> to vector<4x64xf32>
    %7 = arith.addf %4, %6 : vector<4x64xf32>
    %cst = arith.constant 0.000000e+00 : f32
    %8 = vector.broadcast %cst : f32 to vector<4x64xf32>
    %9 = arith.maximumf %7, %8 : vector<4x64xf32>
    %c0_6 = arith.constant 0 : index
    %c0_7 = arith.constant 0 : index
    %10 = vector.load %arg5[%c0_6, %c0_7] : memref<8x4xf32, #tpu.memory_space<vmem>>, vector<8x4xf32>
    %cst_8 = arith.constant dense<0.000000e+00> : vector<8x64xf32>
    %11 = tpu.matmul %10, %9, %cst_8 {dimension_numbers = #tpu.dot_dimension_numbers<[1], [0], [0], [1], [0, 0, 1, 1], [], []>} : vector<8x4xf32>, vector<4x64xf32>, vector<8x64xf32> -> vector<8x64xf32>
    %c0_9 = arith.constant 0 : index
    %c0_10 = arith.constant 0 : index
    %12 = vector.load %arg6[%c0_9, %c0_10] : memref<8x1xf32, #tpu.memory_space<vmem>>, vector<8x1xf32>
    %13 = vector.broadcast %12 : vector<8x1xf32> to vector<8x64xf32>
    %14 = arith.addf %11, %13 : vector<8x64xf32>
    %c0_11 = arith.constant 0 : index
    %c0_12 = arith.constant 0 : index
    %c0_13 = arith.constant 0 : index
    %15 = vector.load %arg7[%c0_11, %c0_12, %c0_13] : memref<1x8x64xf32, #tpu.memory_space<vmem>>, vector<1x8x64xf32>
    %16 = vector.shape_cast %15 : vector<1x8x64xf32> to vector<8x64xf32>
    %17 = vector.shape_cast %14 : vector<8x64xf32> to vector<1x8x64xf32>
    tpu.vector_store %arg7[%c0_11, %c0_12, %c0_13], %17 {strides = array<i32>} : memref<1x8x64xf32, #tpu.memory_space<vmem>>, vector<1x8x64xf32>,
    return
  }
  func.func @transform_0(%arg0: i32, %arg1: i32) -> (i32, i32, i32) {
    %c0_i32 = arith.constant 0 : i32
    %c0_i32_0 = arith.constant 0 : i32
    return %arg0, %c0_i32, %arg1 : i32, i32, i32
  }
  func.func @transform_1(%arg0: i32, %arg1: i32) -> (i32, i32) {
    %c0_i32 = arith.constant 0 : i32
    %c0_i32_0 = arith.constant 0 : i32
    %c0_i32_1 = arith.constant 0 : i32
    return %c0_i32, %c0_i32_0 : i32, i32
  }
  func.func @transform_2(%arg0: i32, %arg1: i32) -> (i32, i32) {
    %c0_i32 = arith.constant 0 : i32
    %c0_i32_0 = arith.constant 0 : i32
    %c0_i32_1 = arith.constant 0 : i32
    return %c0_i32, %c0_i32_0 : i32, i32
  }
  func.func @transform_3(%arg0: i32, %arg1: i32) -> (i32, i32) {
    %c0_i32 = arith.constant 0 : i32
    %c0_i32_0 = arith.constant 0 : i32
    %c0_i32_1 = arith.constant 0 : i32
    return %c0_i32, %c0_i32_0 : i32, i32
  }
  func.func @transform_4(%arg0: i32, %arg1: i32) -> (i32, i32) {
    %c0_i32 = arith.constant 0 : i32
    %c0_i32_0 = arith.constant 0 : i32
    %c0_i32_1 = arith.constant 0 : i32
    return %c0_i32, %c0_i32_0 : i32, i32
  }
  func.func @transform_5(%arg0: i32, %arg1: i32) -> (i32, i32, i32) {
    %c0_i32 = arith.constant 0 : i32
    %c0_i32_0 = arith.constant 0 : i32
    return %arg0, %c0_i32, %arg1 : i32, i32, i32
  }
}

</mosaic_0001>

<bundles_post_ra>
// kernel: tpu_custom_call.1
= control target key start
LH: loop header
LB: loop body
LE: loop exit
PB: predicated region body
PF: predicated region fallthrough
CT: control target
= control target key end

     0   :  { %10 = vsyncpa [#allocation3], 0  ;;  %s752_s0 = inlined_call_operand.vmem [shape: f32[2,4,64], index: 0, kind: input, shape index: {}]   ;;  %s753_s1 = inlined_call_operand.vmem [shape: f32[4,1], index: 1, kind: input, shape index: {}]   ;;  %s754_s2 = inlined_call_operand.vmem [shape: f32[4,1], index: 2, kind: input, shape index: {}]   ;;  %s755_s3 = inlined_call_operand.vmem [shape: f32[8,4], index: 3, kind: input, shape index: {}]   ;;  %s756_s4 = inlined_call_operand.vmem [shape: f32[8,1], index: 4, kind: input, shape index: {}]   ;;  %s757_s5 = inlined_call_operand.hbm [shape: f32[2,8,64], index: 5, kind: output, shape index: {}]  }
   0x1   :  { %12 = vsyncpa [#allocation3 + $0x1], 0  ;;  %s628_s18 = smov 0   ;;  %s630_s19 = smov 0  }
   0x2   :  { %s632_s20 = smov 0   ;;  %s634_s21 = smov 0  }
   0x3   :  { %s636_s22 = smov 0   ;;  %s638_s23 = smov 0  }
   0x4 LB: > { %s434_s24 = sadd.s32 4294967295, %s592_s23   ;;  %s435_s25 = sadd.s32 4294967294, %s592_s23   ;;  %s592_s23 = sphi %s638_s23, %s18_s23   ;;  %s588_s22 = sphi %s636_s22, %s764_s22   ;;  %s584_s21 = sphi %s634_s21, %s763_s21   ;;  %s580_s20 = sphi %s632_s20, %s762_s20   ;;  %s576_s19 = sphi %s630_s19, %s761_s19   ;;  %s572_s18 = sphi %s628_s18, %s760_s18  }
   0x5   : > { %s30_s26 = sadd.s32 1, %s588_s22  ;;  %s151_s27 = sadd.s32 1, %s580_s20 }
   0x6   : > { %p32_p0 = scmp.ge.s32.totalorder %s30_s26, 2  ;;  %p161_p1 = scmp.ne.s32.totalorder %s580_s20, %s576_s19 }
   0x7   : > { %p162_p2 = scmp.eq.s32.totalorder %s434_s24, 1  ;;  %p167_p3 = scmp.ne.s32.totalorder %s576_s19, %s572_s18 }
   0x8   : > { %s766_s26 = smov (%p32_p0, %s30_s26), 0  ;;  %p168_p5 = scmp.eq.s32.totalorder %s435_s25, 1 }
   0x9   : > { %p668_p4 = por %p162_p2, %p161_p1  ;;  %s146_s29 = ssub.s32 %s588_s22, %s766_s26 }
   0xa   : > { %p438_p6 = scmp.ge.s32.totalorder %s592_s23, 1  ;;  %p149_p7 = scmp.eq.s32.totalorder %s146_s29, 0 }
   0xb   : > { %p675_p8 = por %p168_p5, %p167_p3  ;;  %p208_p9 = scmp.lt.s32.totalorder %s592_s23, 3 }
   0xc   : > { %s681_s6 = scalar_select %p149_p7, %s580_s20, %s151_s27  }
   0xd   : > { %p209_p10 = pnand %p438_p6, %p208_p9 }
   0xe   : > { %v246_v0 = vld [vmem:[%s753_s1] sm:$0xf] (!%p209_p10)  ;;  %v594_v1 = vmov (!%p209_p10), 0   ;;  %v595_v3 = vmov (!%p209_p10), 0.0   ;;  %vm596_vm0 = vmmov (!%p209_p10), 0   ;;  %p238_p11 = scmp.lt.s32.totalorder (!%p209_p10), %s584_s21, 1 }
   0xf   : > { %212 = sbr.rel (%p209_p10) target bundleno = 381 (0x17d), region = 40  ;;  %512 = vset.pattern.permute.xlu0 (!%p209_p10), %v594_v1  ;;  %513 = vset.pattern.permute.xlu1 (!%p209_p10), %v594_v1  ;;  %v253_v2 = vld [vmem:[%s754_s2] sm:$0xf] (!%p209_p10)  ;;  %vm272_vm1 = vcmask (!%p209_p10), 1043456   ;;  %vm268_vm2 = vcmask (!%p209_p10), 31744   ;;  %s235_s27 = sand.u32 (!%p209_p10), 1, %s576_s19  }
  0x10   : > { %249 = vperm.xlu0 (!%p209_p10), %512, %v246_v0   ;;  %449 = vmatprep.subr.mxu0 (!%p209_p10), %v595_v3  ;;  %v262_v4 = vld [vmem:[%s756_s4] sm:$0xff] (!%p209_p10)  ;;  %s439_s29 = sshll.u32 (!%p209_p10), %s235_s27, 3  ;;  %s444_s7 = sshll.u32 (!%p209_p10), %s584_s21, 7  ;;  %vm346_vm3 = vcmask (!%p209_p10), 523264  }
  0x11   : > { %451 = vmatprep.mubr.msk.f32.mxu0 (!%p209_p10), %vm596_vm0, %v595_v3  ;;  %265 = vperm.xlu1 (!%p209_p10), %513, %v262_v4   ;;  %v261_v11 = vld [vmem:[%s755_s3] sm:$0xff] (!%p209_p10)  ;;  %s237_s8 = scalar_lea.vmem (!%p209_p10), [#allocation2], %s439_s29  ;;  %s705_s12 = scalar_lea.hbm (!%p209_p10), %s757_s5, %s444_s7 }
  0x12   : > { %s363_s9 = sshll.u32 (!%p209_p10), %s237_s8, 4  ;;  %s707_s9 = int_to_ptr.vmem [resolvable:$true] %s363_s9 }
  0x14   : > { %256 = vperm.xlu0 (!%p209_p10), %512, %v253_v2  }
  0x16   : > { %s239_s13 = scalar_select %p238_p11, %s584_s21, 1 }
  0x17   : > { %s597_s21 = smov [#allocation2]  }
  0x18   : > { %s440_s14 = sshll.u32 %s239_s13, 2  ;;  %s349_s13 = scalar_lea.sflag [#allocation3], %s235_s27 }
  0x19   : > { %s244_s17 = scalar_lea.vmem %s752_s0, %s440_s14  ;;  %s514_s14 = scalar_lea.vmem %s707_s9, 128 }
  0x1a   : > { %v245_v6 = vld [vmem:[%s244_s17] sm:$0xf]  ;;  %p515_p12 = scmp.ne.s32.totalorder %s707_s9, %s514_s14  ;;  %s518_s15 = sshll.u32 %s597_s21, 4  ;;  %s519_s15 = int_to_ptr.vmem [resolvable:$false] %s518_s15 }
  0x1b   : > { %s520_s16 = scalar_lea.vmem %s519_s15, 256  ;;  %p521_p1 = scmp.lt.s32.totalorder %s707_s9, %s519_s15 }
  0x1c   : > { %p516_p13 = pnand %p515_p12, %p668_p4  ;;  %p522_p2 = scmp.lt.s32.totalorder %s520_s16, %s514_s14 }
  0x1e   : > { %p517_p0 = pneg %p516_p13  ;;  %p523_p3 = por %p522_p2, %p521_p1 }
  0x20   : > { %p524_p5 = pnand %p523_p3, %p517_p0 }
  0x8f   : > { %v250_v5 = vpop.permute.xlu0 %249 }
  0x90   : > { %v252_v7 = vmul.f32 %v250_v5, %v245_v6  ;;  %v266_v12 = vpop.permute.xlu1 %265 }
  0x93   : > { %v257_v8 = vpop.permute.xlu0 %256 }
  0x94   : > { %v259_v9 = vadd.f32 %v257_v8, %v252_v7 }
  0x96   : > { %v260_v10 = vmax.f32 %v259_v9, 0.0 }
  0x98   : > { %450 = vmatpush3.msk.msra.mxu0 %vm272_vm1, %v260_v10 }
  0x99   : > { %452 = vmatmul.mubr.msk.f32.vlgmr.msra.gmra.mrb[0].mxu0 %vm268_vm2, %v261_v11 }
 0x16c   : > { %v342_v13 = vpop.f32.mrb[0].mxu0 }
 0x16d   : > { %v343_v14 = vadd.f32 %v342_v13, %v266_v12  ;;  %v453_v15 = vpop.f32.mrb[1].mxu0 }
 0x16f   : > { %347 = vst.msk [vmem:[%s237_s8] sm:$0xff] %vm346_vm3, %v343_v14 }
 0x170   : > { %527 = shalt.err (!%p524_p5)
}
 0x171   : > { %s528_s17 = scalar_lea.hbm %s705_s12, 128  ;;  %s532_s27 = scalar_lea.hbm %s757_s5, 256 }
 0x172   : > { %p529_p6 = scmp.ne.s32.totalorder %s705_s12, %s528_s17  ;;  %p533_p10 = scmp.lt.u32.totalorder %s705_s12, %s757_s5 }
 0x173   : > { %p534_p11 = scmp.lt.u32.totalorder %s532_s27, %s528_s17  ;;  %p536_p13 = scmp.lt.u32.totalorder %s528_s17, %s705_s12 }
 0x174   : > { %p530_p7 = pnand %p529_p6, %p668_p4 }
 0x175   : > { %p535_p12 = por %p534_p11, %p533_p10 }
 0x176   : > { %p531_p9 = pneg %p530_p7 }
 0x177   : > { %p537_p0 = por %p536_p13, %p535_p12 }
 0x179   : > { %p538_p1 = pnand %p537_p0, %p531_p9 }
 0x17b   : > { %541 = shalt.err (!%p538_p1)
}
 0x17c   : > { %454 = dma.vmem_to_hbm [thread:$0]  (%p668_p4), %s707_s9, 128, %s705_s12, %s349_s13  }
 0x17d PF: > { %p460_p2 = scmp.ge.s32.totalorder %s592_s23, 2  ;;  %s375_s8 = sand.u32 1, %s572_s18  }
 0x17e   : > { %s376_s10 = scalar_lea.sflag [#allocation3], %s375_s8 }
 0x17f   : > { %p457_p3 = pnand %p460_p2, %p675_p8 }
 0x181   : > { %567 = dma.done.wait (!%p457_p3), %s376_s10, 128  }
 0x182   : > { %569 = vsyncadd (!%p457_p3), %s376_s10, 4294967168  ;;  %s18_s23 = sadd.s32 1, %s592_s23   ;;  %s760_s18 = smov %s576_s19 }
 0x183   : > { %p15_p5 = scmp.ge.s32.totalorder %s18_s23, 4   ;;  %s761_s19 = smov %s580_s20 }
 0x184   : > { %s762_s20 = smov %s681_s6  ;;  %s763_s21 = smov %s588_s22 }
 0x185   : > { %s764_s22 = smov %s766_s26  ;;  %17 = sbr.rel (!%p15_p5) target bundleno = 4 (0x4), region = 75 }
 0x18c   :  { %381 = vsyncpa [#allocation3], 1 }
 0x18d   :  { %383 = vsyncpa [#allocation3 + $0x1], 1 }

</bundles_post_ra>
